<compile_context>
chip_gen: v5e
topology: v5e:2x2
jax: 0.10.0
libtpu: 0.0.40
codegen_flags: <defaults>
</compile_context>

<pallas_src>
import jax
import jax.numpy as jnp
from jax.experimental import pallas as pl
from jax.experimental.pallas import tpu as pltpu


# ---------------------------------------------------------------------------
# Helpers
# ---------------------------------------------------------------------------
def _round_up(v, m):
    return (v + m - 1) // m * m


def _vmem_capacity_bytes():
    try:
        return int(pltpu.get_tpu_info().vmem_capacity_bytes)
    except Exception:
        return 64 * 1024 * 1024  # conservative fallback (v7x per-TC VMEM)


# ---------------------------------------------------------------------------
# Kernel 1: attention score  tanh(A @ (X @ W) + b)
#   grid = (row tiles, column chunks); reduction (column) axis last, "arbitrary";
#   accumulate into the resident lane-dense (1, TM) output block.
# ---------------------------------------------------------------------------
def attn_gcn_score(adjacency, x, w, b):
    n = x.shape[0]
    cap = _vmem_capacity_bytes()

    tc = min(_round_up(n, 128), 4096)              # column chunk (lanes)
    tm = 1024                                      # row tile; A double-buffer <= cap//8
    while tm > 128 and 2 * tm * tc * 4 > cap // 8:
        tm //= 2
    tm = min(tm, _round_up(n, 128))
    n_row = pl.cdiv(n, tm)
    n_col = pl.cdiv(n, tc)

    # support = X @ W computed once (tiny (N,D)x(D,1)); laid out as a lane-dense row.
    support = (x @ w).reshape(1, n).astype(jnp.float32)
    bias = b.reshape(1, 1).astype(jnp.float32)

    def kernel(a_ref, s_ref, b_ref, o_ref):
        # a_ref: (TM, TC) raw adjacency block (ragged edges read garbage)
        # s_ref: (1, TC)  support row chunk
        # b_ref: (1, 1)   bias scalar in SMEM
        # o_ref: (1, TM)  lane-dense partial-sum / score block (resident across columns)
        j = pl.program_id(1)

        @pl.when(j == 0)
        def _():
            o_ref[...] = jnp.zeros_like(o_ref)

        col_ids = j * tc + jax.lax.broadcasted_iota(jnp.int32, a_ref.shape, 1)
        # Mask AFTER the multiply via where: garbage (even NaN/Inf) columns become 0.
        prod = jnp.where(col_ids < n, a_ref[...] * s_ref[...], 0.0)
        o_ref[...] += jnp.sum(prod, axis=1).reshape(1, -1)

        @pl.when(j == pl.num_programs(1) - 1)
        def _():
            o_ref[...] = jnp.tanh(o_ref[...] + b_ref[0, 0])

    out = pl.pallas_call(
        kernel,
        out_shape=jax.ShapeDtypeStruct((1, n_row * tm), jnp.float32),
        grid=(n_row, n_col),
        in_specs=[
            pl.BlockSpec((tm, tc), lambda i, j: (i, j)),         # streamed A blocks
            pl.BlockSpec((1, tc), lambda i, j: (0, j)),          # support row chunk
            pl.BlockSpec(memory_space=pltpu.MemorySpace.SMEM),   # (1,1) bias scalar
        ],
        out_specs=pl.BlockSpec((1, tm), lambda i, j: (0, i)),    # lane-dense output
        compiler_params=pltpu.CompilerParams(
            dimension_semantics=("parallel", "arbitrary"),
            vmem_limit_bytes=cap // 2,                           # usage ~cap//8 -> headroom
        ),
    )(adjacency.astype(jnp.float32), support, bias)
    return out[0, :n]                                            # squeeze + drop ragged tail


# ---------------------------------------------------------------------------
# Kernel 2: fused gather + scale  hidden = X[idx] * attn[idx][:, None]
#   R rows per grid step; X stays in HBM, manual row DMAs kept in flight.
# ---------------------------------------------------------------------------
_GATHER_ROWS = 8


def gather_scale(x, attn_score, idx):
    n, d = x.shape
    k = idx.shape[0]
    r = _GATHER_ROWS
    dp = _round_up(d, 128)
    # Lane-dense rows: pad feature dim once (real models keep D a multiple of 128).
    x_p = x if dp == d else jnp.pad(x, ((0, 0), (0, dp - d)))
    kp = _round_up(k, r)
    idx_p = jnp.pad(idx.astype(jnp.int32), (0, kp - k))                 # pad with row 0 (valid)
    attn_g = jnp.pad(attn_score[idx].astype(jnp.float32), (0, kp - k))  # tiny K-float gather

    def kernel(idx_ref, attn_ref, x_hbm, o_ref, buf, sem):
        # idx_ref : (KP,) i32 SMEM   attn_ref: (KP,) f32 SMEM
        # x_hbm   : (N, Dp) f32 HBM  o_ref: (R, Dp) VMEM output block
        # buf     : (R, Dp) VMEM scratch   sem: DMA sems (R,)
        base = pl.program_id(0) * r
        copies = []
        for t in range(r):                       # issue all R row DMAs (kept in flight)
            cp = pltpu.make_async_copy(
                x_hbm.at[pl.ds(idx_ref[base + t], 1)], buf.at[pl.ds(t, 1)], sem.at[t])
            cp.start()
            copies.append(cp)
        for t in range(r):                       # drain, scale, store (lane-dense)
            copies[t].wait()
            o_ref[pl.ds(t, 1), :] = buf[pl.ds(t, 1), :] * attn_ref[base + t]

    out = pl.pallas_call(
        kernel,
        out_shape=jax.ShapeDtypeStruct((kp, dp), jnp.float32),
        grid=(kp // r,),
        in_specs=[
            pl.BlockSpec(memory_space=pltpu.MemorySpace.SMEM),   # idx
            pl.BlockSpec(memory_space=pltpu.MemorySpace.SMEM),   # attn[idx]
            pl.BlockSpec(memory_space=pl.ANY),                   # X stays in HBM
        ],
        out_specs=pl.BlockSpec((r, dp), lambda i: (i, 0)),
        scratch_shapes=[pltpu.VMEM((r, dp), jnp.float32),
                        pltpu.SemaphoreType.DMA((r,))],
        compiler_params=pltpu.CompilerParams(dimension_semantics=("parallel",)),
    )(idx_p, attn_g, x_p.astype(jnp.float32))
    return out[:k, :d]


# ---------------------------------------------------------------------------
# Kernel 3: filtered adjacency renormalization with fused binarization
#   B = (a_sub != 0) off-diagonal;  L = D^-0.5 (B+I) D^-0.5,  D = diag(row sums)
# ---------------------------------------------------------------------------
def _binarized_with_self_loops(a_ref, row_offset):
    """a_hat = (a != 0, diagonal forced to 1), built in-register from the raw tile."""
    shape = a_ref.shape
    rows = row_offset + jax.lax.broadcasted_iota(jnp.int32, shape, 0)
    cols = jax.lax.broadcasted_iota(jnp.int32, shape, 1)
    return jnp.where(rows == cols, 1.0, (a_ref[...] != 0.0).astype(jnp.float32))


def _renorm_fused_kernel(a_ref, o_ref):
    # Whole (K,K) submatrix resident: binarize + degree + rsqrt + outer scaling, one pass.
    a_hat = _binarized_with_self_loops(a_ref, 0)
    dinv_col = jax.lax.rsqrt(jnp.sum(a_hat, axis=1, keepdims=True))      # (K,1)
    dinv_row = jax.lax.rsqrt(jnp.sum(a_hat, axis=1)).reshape(1, -1)      # (1,K), same values
    o_ref[...] = dinv_col * a_hat * dinv_row


def _renormalize_two_pass(a_sub, cap):
    """Row-tiled fallback for large K. No padded copy: full-width column blocks; ragged
    row edges produce garbage that is discarded by the (1,K)/(K,K) output clipping."""
    k = a_sub.shape[0]
    # input + output double buffers: ~4 * tk * k * 4 bytes; keep <= cap//4 (2x headroom).
    tk = 1024
    while tk > 128 and 4 * tk * k * 4 > cap // 4:
        tk //= 2
    n_row = pl.cdiv(k, tk)
    params = pltpu.CompilerParams(dimension_semantics=("parallel",),
                                  vmem_limit_bytes=cap // 2)

    def dinv_kernel(a_ref, o_ref):
        # a_ref: (TK, K) raw rows; o_ref: (1, TK) lane-dense deg^-0.5 slice
        a_hat = _binarized_with_self_loops(a_ref, pl.program_id(0) * a_ref.shape[0])
        o_ref[...] = jax.lax.rsqrt(jnp.sum(a_hat, axis=1)).reshape(1, -1)

    dinv = pl.pallas_call(
        dinv_kernel,
        out_shape=jax.ShapeDtypeStruct((1, k), jnp.float32),
        grid=(n_row,),
        in_specs=[pl.BlockSpec((tk, k), lambda i: (i, 0))],
        out_specs=pl.BlockSpec((1, tk), lambda i: (0, i)),
        compiler_params=params,
    )(a_sub)

    dinv_col = dinv.reshape(k, 1)   # tiny K-float XLA reshape; feeds (TK,1) row-scale blocks

    def renorm_kernel(a_ref, drow_ref, dcol_ref, o_ref):
        # Reuse dinv for BOTH sides: no re-binarize/re-sum, no in-kernel transpose.
        a_hat = _binarized_with_self_loops(a_ref, pl.program_id(0) * a_ref.shape[0])
        o_ref[...] = dcol_ref[...] * a_hat * drow_ref[...]

    return pl.pallas_call(
        renorm_kernel,
        out_shape=jax.ShapeDtypeStruct((k, k), jnp.float32),
        grid=(n_row,),
        in_specs=[pl.BlockSpec((tk, k), lambda i: (i, 0)),
                  pl.BlockSpec((1, k), lambda i: (0, 0)),      # column scales (resident)
                  pl.BlockSpec((tk, 1), lambda i: (i, 0))],    # row scales
        out_specs=pl.BlockSpec((tk, k), lambda i: (i, 0)),
        compiler_params=params,
    )(a_sub, dinv, dinv_col)


def renormalize_filtered(a_sub):
    k = a_sub.shape[0]
    cap = _vmem_capacity_bytes()
    # Fused resident path when (double-buffered) in+out K x K f32 blocks fit with headroom
    # (~K <= 1.4K on v7x, ~2K on v5e/v6e); otherwise tiled two-pass fallback.
    if 6 * k * k * 4 <= cap // 2:
        return pl.pallas_call(
            _renorm_fused_kernel,
            out_shape=jax.ShapeDtypeStruct((k, k), jnp.float32),
            in_specs=[pl.BlockSpec(memory_space=pltpu.MemorySpace.VMEM)],
            out_specs=pl.BlockSpec(memory_space=pltpu.MemorySpace.VMEM),
            compiler_params=pltpu.CompilerParams(vmem_limit_bytes=cap // 2),
        )(a_sub)
    return _renormalize_two_pass(a_sub, cap)


# ---------------------------------------------------------------------------
# Glue: per-graph top-k without a per-graph device-op loop
# ---------------------------------------------------------------------------
def top_rank_indices(attn_score, graph_indicator, keep_ratio, graph_sizes):
    """torch top_rank(): per graph keep int(keep_ratio*n) highest-scoring nodes; returns
    kept node indices in original node order (boolean-mask semantics). Two stable argsorts
    (score desc, then graph id asc) avoid any float-key precision loss for large ids."""
    order_by_score = jnp.argsort(-attn_score, stable=True)       # scores descending
    order_by_graph = jnp.argsort(graph_indicator[order_by_score], stable=True)
    perm = order_by_score[order_by_graph]   # graphs ascending, scores descending within
    kept_pos = []
    off = 0
    for n_g in graph_sizes:                 # static python ints -> static gather positions
        keep_g = int(keep_ratio * n_g)      # same truncation as the torch reference
        kept_pos.extend(range(off, off + keep_g))
        off += n_g
    kept_pos = jnp.asarray(kept_pos, dtype=jnp.int32)
    return jnp.sort(perm[kept_pos]).astype(jnp.int32)


def self_attention_pooling(adjacency, input_feature, graph_indicator,
                           weight, bias, keep_ratio, graph_sizes):
    # 1) attn_score = tanh(GCN(A, X))          -- Pallas kernel 1 (row x column tiled)
    attn_score = attn_gcn_score(adjacency, input_feature, weight, bias)

    # 2) per-graph top-k kept-node indices     -- XLA glue (two stable argsorts)
    idx = top_rank_indices(attn_score, graph_indicator, keep_ratio, graph_sizes)

    # 3) hidden = X[idx] * attn[idx][:, None]  -- Pallas kernel 2 (chunked gather + scale)
    hidden = gather_scale(input_feature, attn_score, idx)

    mask_graph_indicator = graph_indicator[idx]

    # 4) filter_adjacency: raw K x K submatrix gather (XLA), then binarize + renormalize
    #    fused inside Pallas kernel 3.
    # TODO(synk): the data-dependent 2-D gather adjacency[idx][:, idx] stays in XLA.
    a_sub = adjacency[idx][:, idx]
    mask_adjacency = renormalize_filtered(a_sub)

    return hidden, mask_graph_indicator, mask_adjacency


# ---------------------------------------------------------------------------
# Pure-JAX reference (same semantics as the torch module) for verification
# ---------------------------------------------------------------------------
def _reference(adjacency, x, graph_indicator, w, b, idx):
    score = jnp.tanh(adjacency @ (x @ w) + b[0]).reshape(-1)
    hidden = x[idx] * score[idx][:, None]
    n = x.shape[0]
    k = idx.shape[0]
    b_full = ((adjacency != 0) & (~jnp.eye(n, dtype=bool))).astype(jnp.float32)
    b_sub = b_full[idx][:, idx]
    a_hat = b_sub + jnp.eye(k, dtype=jnp.float32)
    dinv = a_hat.sum(1) ** -0.5
    l = dinv[:, None] * a_hat * dinv[None, :]
    return score, hidden, graph_indicator[idx], l


# ---------------------------------------------------------------------------
# Main
# ---------------------------------------------------------------------------
if __name__ == "__main__":
    key = jax.random.PRNGKey(0)
    k_x, k_a, k_w = jax.random.split(key, 3)

    N, D = 16, 8
    graph_sizes = [8, 8]
    keep_ratio = 0.5
    graph_indicator = jnp.array([0] * 8 + [1] * 8, dtype=jnp.int32)

    x = jax.random.normal(k_x, (N, D), dtype=jnp.float32)

    # random symmetric block-diagonal binary adjacency (no self loops)
    raw = jax.random.uniform(k_a, (N, N))
    a_bin = ((raw + raw.T) > 1.0).astype(jnp.float32)
    block = jnp.zeros((N, N), jnp.float32)
    off = 0
    for gs in graph_sizes:
        block = block.at[off:off + gs, off:off + gs].set(1.0)
        off += gs
    a_bin = a_bin * block * (1.0 - jnp.eye(N, dtype=jnp.float32))

    # normalized adjacency D^-0.5 (A + I) D^-0.5 (what the module consumes)
    a_hat0 = a_bin + jnp.eye(N, dtype=jnp.float32)
    dnorm = a_hat0.sum(1) ** -0.5
    adjacency = dnorm[:, None] * a_hat0 * dnorm[None, :]

    # GraphConvolution(input_dim, 1) params (kaiming-uniform-ish), zero bias
    bound = jnp.sqrt(6.0)
    weight = jax.random.uniform(k_w, (D, 1), jnp.float32, -bound, bound)
    bias = jnp.zeros((1,), jnp.float32)

    hidden, mask_gi, mask_adj = self_attention_pooling(
        adjacency, x, graph_indicator, weight, bias, keep_ratio, graph_sizes)
    jax.block_until_ready((hidden, mask_gi, mask_adj))

    K = sum(int(keep_ratio * g) for g in graph_sizes)
    assert hidden.shape == (K, D)
    assert mask_gi.shape == (K,)
    assert mask_adj.shape == (K, K)

    # numerical check against the pure-JAX reference
    attn_score = attn_gcn_score(adjacency, x, weight, bias)
    idx = top_rank_indices(attn_score, graph_indicator, keep_ratio, graph_sizes)
    ref_score, ref_hidden, ref_gi, ref_adj = _reference(
        adjacency, x, graph_indicator, weight, bias, idx)
    assert jnp.allclose(attn_score, ref_score, atol=1e-3, rtol=1e-3)
    assert jnp.allclose(hidden, ref_hidden, atol=1e-3, rtol=1e-3)
    assert bool(jnp.all(mask_gi == ref_gi))
    assert jnp.allclose(mask_adj, ref_adj, atol=1e-3, rtol=1e-3)

    print("KERNEL_OK")
</pallas_src>

<mosaic_0001>
module attributes {stable_mosaic.version = 11 : i64} {
  func.func @kernel(%arg0: i32, %arg1: i32, %arg2: memref<128x128xf32, #tpu.memory_space<vmem>>, %arg3: memref<1x128xf32, #tpu.memory_space<vmem>>, %arg4: memref<1x1xf32, #tpu.memory_space<smem>>, %arg5: memref<1x128xf32, #tpu.memory_space<vmem>>) attributes {dimension_semantics = [#tpu.dimension_semantics<parallel>, #tpu.dimension_semantics<arbitrary>], iteration_bounds = array<i64: 1, 1>, scalar_prefetch = 0 : i64, scratch_operands = 0 : i64, tpu.core_type = #tpu.core_type<tc>, window_params = [{transform_indices = @transform_0, window_bounds = array<i64: 128, 128>}, {transform_indices = @transform_1, window_bounds = array<i64: 1, 128>}, {transform_indices = @transform_2, window_bounds = array<i64: 1, 1>}, {transform_indices = @transform_3, window_bounds = array<i64: 1, 128>}]} {
    %c0_i32 = arith.constant 0 : i32
    %0 = arith.cmpi eq, %arg1, %c0_i32 : i32
    %1 = arith.extui %0 : i1 to i32
    %c0_i32_0 = arith.constant 0 : i32
    %2 = arith.cmpi ne, %1, %c0_i32_0 : i32
    scf.if %2 {
      %cst_11 = arith.constant 0.000000e+00 : f32
      %23 = vector.broadcast %cst_11 : f32 to vector<1x128xf32>
      %c0_12 = arith.constant 0 : index
      %c0_13 = arith.constant 0 : index
      %24 = vector.load %arg5[%c0_12, %c0_13] : memref<1x128xf32, #tpu.memory_space<vmem>>, vector<1x128xf32>
      tpu.vector_store %arg5[%c0_12, %c0_13], %23 {strides = array<i32>} : memref<1x128xf32, #tpu.memory_space<vmem>>, vector<1x128xf32>,
    } else {
    }
    %c128_i32 = arith.constant 128 : i32
    %3 = arith.muli %arg1, %c128_i32 : i32
    %4 = tpu.iota {dimensions = array<i32: 1>} : vector<128x128xi32>
    %5 = vector.broadcast %3 : i32 to vector<128x128xi32>
    %6 = arith.addi %5, %4 : vector<128x128xi32>
    %c16_i32 = arith.constant 16 : i32
    %7 = vector.broadcast %c16_i32 : i32 to vector<128x128xi32>
    %8 = arith.cmpi slt, %6, %7 : vector<128x128xi32>
    %c0 = arith.constant 0 : index
    %c0_1 = arith.constant 0 : index
    %9 = vector.load %arg2[%c0, %c0_1] : memref<128x128xf32, #tpu.memory_space<vmem>>, vector<128x128xf32>
    %c0_2 = arith.constant 0 : index
    %c0_3 = arith.constant 0 : index
    %10 = vector.load %arg3[%c0_2, %c0_3] : memref<1x128xf32, #tpu.memory_space<vmem>>, vector<1x128xf32>
    %11 = vector.broadcast %10 : vector<1x128xf32> to vector<128x128xf32>
    %12 = arith.mulf %9, %11 : vector<128x128xf32>
    %cst = arith.constant 0.000000e+00 : f32
    %13 = vector.broadcast %cst : f32 to vector<128x128xf32>
    %14 = arith.select %8, %12, %13 : vector<128x128xi1>, vector<128x128xf32>
    %c0_4 = arith.constant 0 : index
    %c0_5 = arith.constant 0 : index
    %15 = vector.load %arg5[%c0_4, %c0_5] : memref<1x128xf32, #tpu.memory_space<vmem>>, vector<1x128xf32>
    %cst_6 = arith.constant dense<0.000000e+00> : vector<128xf32>
    %16 = vector.multi_reduction <add>, %14, %cst_6 [1] : vector<128x128xf32> to vector<128xf32>
    %17 = vector.shape_cast %16 : vector<128xf32> to vector<1x128xf32>
    %18 = arith.addf %15, %17 : vector<1x128xf32>
    %c0_7 = arith.constant 0 : index
    %c0_8 = arith.constant 0 : index
    %19 = vector.load %arg5[%c0_7, %c0_8] : memref<1x128xf32, #tpu.memory_space<vmem>>, vector<1x128xf32>
    tpu.vector_store %arg5[%c0_7, %c0_8], %18 {strides = array<i32>} : memref<1x128xf32, #tpu.memory_space<vmem>>, vector<1x128xf32>,
    %c0_i32_9 = arith.constant 0 : i32
    %20 = arith.cmpi eq, %arg1, %c0_i32_9 : i32
    %21 = arith.extui %20 : i1 to i32
    %c0_i32_10 = arith.constant 0 : i32
    %22 = arith.cmpi ne, %21, %c0_i32_10 : i32
    scf.if %22 {
      %c0_11 = arith.constant 0 : index
      %c0_12 = arith.constant 0 : index
      %23 = vector.load %arg5[%c0_11, %c0_12] : memref<1x128xf32, #tpu.memory_space<vmem>>, vector<1x128xf32>
      %c0_13 = arith.constant 0 : index
      %c0_14 = arith.constant 0 : index
      %24 = memref.load %arg4[%c0_13, %c0_14] : memref<1x1xf32, #tpu.memory_space<smem>>
      %25 = vector.broadcast %24 : f32 to vector<1x128xf32>
      %26 = arith.addf %23, %25 : vector<1x128xf32>
      %27 = math.tanh %26 : vector<1x128xf32>
      %c0_15 = arith.constant 0 : index
      %c0_16 = arith.constant 0 : index
      %28 = vector.load %arg5[%c0_15, %c0_16] : memref<1x128xf32, #tpu.memory_space<vmem>>, vector<1x128xf32>
      tpu.vector_store %arg5[%c0_15, %c0_16], %27 {strides = array<i32>} : memref<1x128xf32, #tpu.memory_space<vmem>>, vector<1x128xf32>,
    } else {
    }
    return
  }
  func.func @transform_0(%arg0: i32, %arg1: i32) -> (i32, i32) {
    %c0_i32 = arith.constant 0 : i32
    return %arg0, %arg1 : i32, i32
  }
  func.func @transform_1(%arg0: i32, %arg1: i32) -> (i32, i32) {
    %c0_i32 = arith.constant 0 : i32
    %c0_i32_0 = arith.constant 0 : i32
    return %c0_i32, %arg1 : i32, i32
  }
  func.func @transform_2(%arg0: i32, %arg1: i32) -> (i32, i32) {
    %c0_i32 = arith.constant 0 : i32
    %c0_i32_0 = arith.constant 0 : i32
    %c0_i32_1 = arith.constant 0 : i32
    return %c0_i32, %c0_i32_0 : i32, i32
  }
  func.func @transform_3(%arg0: i32, %arg1: i32) -> (i32, i32) {
    %c0_i32 = arith.constant 0 : i32
    %c0_i32_0 = arith.constant 0 : i32
    return %c0_i32, %arg0 : i32, i32
  }
}

</mosaic_0001>

<bundles_post_ra>
// kernel: tpu_custom_call.1
= control target key start
LH: loop header
LB: loop body
LE: loop exit
PB: predicated region body
PF: predicated region fallthrough
CT: control target
= control target key end

     0   :  { %9 = vsyncpa [#allocation4], 0  ;;  %s714_s0 = inlined_call_operand.hbm [shape: f32[16,16], index: 0, kind: input, shape index: {}]   ;;  %s715_s1 = inlined_call_operand.vmem [shape: f32[1,16], index: 1, kind: input, shape index: {}]   ;;  %s716_s2 = inlined_call_operand.<no memory space> [shape: f32[1,1], index: 2, kind: input, shape index: {}]   ;;  %s717_s3 = inlined_call_operand.hbm [shape: f32[1,128], index: 3, kind: output, shape index: {}]  }
   0x1   :  { %10 = vsyncpa [#allocation5], 0 }
   0x2   :  { %14 = vsyncadd [#allocation4], 1792  ;;  %s15_s14 = sshll.u32 %s714_s0, 4  ;;  %s625_s15 = smov [#allocation3]   ;;  %s16_s14 = int_to_ptr.hbm [resolvable:$true] %s15_s14 }
   0x3   :  { %s17_s16 = sshll.u32 %s625_s15, 4  ;;  %s626_s17 = smov 128   ;;  %s18_s16 = int_to_ptr.vmem [resolvable:$true] %s17_s16 }
   0x4   :  { %s627_s18 = smov 8  }
   0x5   :  { %23 = dma.hbm_to_vmem [thread:$0]  %s16_s14, 256, %s18_s16, [#allocation4], %s626_s17, %s626_s17, %s627_s18  }
   0x6   :  { %621 = dma.done.wait [#allocation4], 2048  }
   0x7   :  { %622 = vsyncadd [#allocation4], 4294965248  ;;  %v38_v0 = vlaneseq  ;;  %v43_v2 = vld [vmem:[#allocation3] sm:$0xff]  ;;  %v570_v3 = vld [vmem:[%s715_s1] ss:$0 sm:$0xff]  ;;  %v628_v51 = vmov 0  }
   0x8   :  { %v45_v4 = vld [vmem:[#allocation3 + $0x10] sm:$0xff]  ;;  %v63_v5 = vmul.f32 %v570_v3, %v43_v2  ;;  %v47_v7 = vld [vmem:[#allocation3 + $0x20] sm:$0xff]  ;;  %v44_v8 = vld [vmem:[#allocation3 + $0x8] sm:$0xff]  ;;  %567 = vset.pattern.permute.xlu1 %v628_v51  ;;  %568 = vset.pattern.permute.xlu2 %v628_v51  ;;  %vm474_vm1 = vcmask 130112   ;;  %vm478_vm2 = vcmask 195712   ;;  %vm482_vm3 = vcmask 261312  }
   0x9   :  { %v654_v1 = vand.u32 127, %v38_v0  ;;  %v65_v6 = vmul.f32 %v570_v3, %v45_v4  ;;  %v46_v9 = vld [vmem:[#allocation3 + $0x18] sm:$0xff]  ;;  %v67_v10 = vmul.f32 %v570_v3, %v47_v7  ;;  %v48_v13 = vld [vmem:[#allocation3 + $0x28] sm:$0xff]  ;;  %v64_v15 = vmul.f32 %v570_v3, %v44_v8  ;;  %v49_v21 = vld [vmem:[#allocation3 + $0x30] sm:$0xff]  ;;  %569 = vset.pattern.permute.xlu0 %v628_v51  ;;  %s630_s21 = smov [#allocation6]   ;;  %s551_s25 = sshll.u32 %s717_s3, 4  ;;  %s552_s25 = int_to_ptr.hbm [resolvable:$true] %s551_s25 }
   0xa   :  { %v66_v16 = vmul.f32 %v570_v3, %v46_v9  ;;  %v68_v17 = vmul.f32 %v570_v3, %v48_v13  ;;  %v50_v22 = vld [vmem:[#allocation3 + $0x38] sm:$0xff]  ;;  %v51_v23 = vld [vmem:[#allocation3 + $0x40] sm:$0xff]  ;;  %v69_v24 = vmul.f32 %v570_v3, %v49_v21  ;;  %v52_v30 = vld [vmem:[#allocation3 + $0x48] sm:$0xff]  ;;  %vm486_vm4 = vcmask 326912   ;;  %s549_s22 = sshll.u32 %s630_s21, 4  ;;  %s550_s22 = int_to_ptr.vmem [resolvable:$true] %s549_s22 }
   0xb   :  { %vm42_vm0 = vcmp.lt.s32.totalorder %v654_v1, 16  ;;  %v70_v25 = vmul.f32 %v570_v3, %v50_v22  ;;  %v71_v26 = vmul.f32 %v570_v3, %v51_v23  ;;  %v53_v31 = vld [vmem:[#allocation3 + $0x50] sm:$0xff]  ;;  %v54_v32 = vld [vmem:[#allocation3 + $0x58] sm:$0xff]  ;;  %v72_v33 = vmul.f32 %v570_v3, %v52_v30  ;;  %v55_v39 = vld [vmem:[#allocation3 + $0x60] sm:$0xff] }
   0xc   :  { %v79_v11 = vsel %vm42_vm0, %v63_v5, 0.0  ;;  %v81_v12 = vsel %vm42_vm0, %v65_v6, 0.0  ;;  %v83_v14 = vsel %vm42_vm0, %v67_v10, 0.0  ;;  %v80_v18 = vsel %vm42_vm0, %v64_v15, 0.0  ;;  %v56_v40 = vld [vmem:[#allocation3 + $0x68] sm:$0xff]  ;;  %v57_v41 = vld [vmem:[#allocation3 + $0x70] sm:$0xff] }
   0xd   :  { %96 = vadd.xlane.f32.xlu0 %v79_v11  ;;  %100 = vadd.xlane.f32.xlu1 %v81_v12  ;;  %v82_v19 = vsel %vm42_vm0, %v66_v16, 0.0  ;;  %v84_v20 = vsel %vm42_vm0, %v68_v17, 0.0  ;;  %v85_v27 = vsel %vm42_vm0, %v69_v24, 0.0  ;;  %v86_v28 = vsel %vm42_vm0, %v70_v25, 0.0  ;;  %v58_v48 = vld [vmem:[#allocation3 + $0x78] sm:$0xff] }
   0xe   :  { %104 = vadd.xlane.f32.xlu2 %v83_v14  ;;  %v87_v29 = vsel %vm42_vm0, %v71_v26, 0.0  ;;  %v73_v34 = vmul.f32 %v570_v3, %v53_v31  ;;  %v74_v35 = vmul.f32 %v570_v3, %v54_v32  ;;  %v88_v36 = vsel %vm42_vm0, %v72_v33, 0.0 }
   0xf   :  { %v75_v42 = vmul.f32 %v570_v3, %v55_v39  ;;  %v76_v43 = vmul.f32 %v570_v3, %v56_v40  ;;  %v77_v44 = vmul.f32 %v570_v3, %v57_v41  ;;  %v78_v49 = vmul.f32 %v570_v3, %v58_v48 }
  0x10   :  { %v89_v37 = vsel %vm42_vm0, %v73_v34, 0.0  ;;  %v90_v38 = vsel %vm42_vm0, %v74_v35, 0.0  ;;  %vm490_vm5 = vcmask 392512   ;;  %vm494_vm6 = vcmask 458112  }
  0x11   :  { %v91_v45 = vsel %vm42_vm0, %v75_v42, 0.0  ;;  %v92_v46 = vsel %vm42_vm0, %v76_v43, 0.0  ;;  %v93_v47 = vsel %vm42_vm0, %v77_v44, 0.0  ;;  %v94_v50 = vsel %vm42_vm0, %v78_v49, 0.0 }
  0x12   :  { %vm498_vm7 = vcmask 523712   ;;  %vm502_vm8 = vcmask 589312   ;;  %vm506_vm9 = vcmask 654912   ;;  %vm510_vm10 = vcmask 720512  }
  0x13   :  { %vm514_vm11 = vcmask 786112   ;;  %vm518_vm12 = vcmask 851712   ;;  %vm522_vm13 = vcmask 917312   ;;  %vm526_vm14 = vcmask 982912  }
  0x14   :  { %vm530_vm15 = vcmask 1048512  }
  0x15   :  { %98 = vadd.xlane.f32.xlu0 %v80_v18  ;;  %102 = vadd.xlane.f32.xlu1 %v82_v19 }
  0x16   :  { %106 = vadd.xlane.f32.xlu2 %v84_v20 }
  0x1d   :  { %108 = vadd.xlane.f32.xlu0 %v85_v27  ;;  %110 = vadd.xlane.f32.xlu1 %v86_v28 }
  0x1e   :  { %112 = vadd.xlane.f32.xlu2 %v87_v29 }
  0x25   :  { %114 = vadd.xlane.f32.xlu0 %v88_v36  ;;  %116 = vadd.xlane.f32.xlu1 %v89_v37 }
  0x26   :  { %118 = vadd.xlane.f32.xlu2 %v90_v38 }
  0x2d   :  { %120 = vadd.xlane.f32.xlu0 %v91_v45  ;;  %122 = vadd.xlane.f32.xlu1 %v92_v46 }
  0x2e   :  { %124 = vadd.xlane.f32.xlu2 %v93_v47 }
  0x35   :  { %126 = vadd.xlane.f32.xlu0 %v94_v50 }
  0x80   :  { %v97_v52 = vpop.xlane.xlu0 %96  ;;  %v101_v8 = vpop.xlane.xlu1 %100 }
  0x81   :  { %v144_v53 = vperm.slane %v97_v52, 0  ;;  %v145_v54 = vperm.slane %v97_v52, 1  ;;  %v146_v55 = vperm.slane %v97_v52, 2  ;;  %v147_v56 = vperm.slane %v97_v52, 3  ;;  %v105_v28 = vpop.xlane.xlu2 %104 }
  0x82   :  { %v148_v57 = vperm.slane %v97_v52, 4  ;;  %v149_v58 = vperm.slane %v97_v52, 5  ;;  %v150_v59 = vperm.slane %v97_v52, 6  ;;  %v151_v60 = vperm.slane %v97_v52, 7 }
  0x83   :  { %272 = vst [vmem:[#allocation1] ss:$9 sm:$0xff] %v144_v53  ;;  %v160_v9 = vperm.slane %v101_v8, 0  ;;  %v161_v10 = vperm.slane %v101_v8, 1  ;;  %v162_v11 = vperm.slane %v101_v8, 2  ;;  %v163_v13 = vperm.slane %v101_v8, 3 }
  0x84   :  { %274 = vst [vmem:[#allocation1 + $0x1] ss:$9 sm:$0xff] %v145_v54  ;;  %v164_v14 = vperm.slane %v101_v8, 4  ;;  %v165_v15 = vperm.slane %v101_v8, 5  ;;  %v166_v16 = vperm.slane %v101_v8, 6  ;;  %v167_v17 = vperm.slane %v101_v8, 7 }
  0x85   :  { %276 = vst [vmem:[#allocation1 + $0x2] ss:$9 sm:$0xff] %v146_v55  ;;  %v176_v29 = vperm.slane %v105_v28, 0  ;;  %v177_v30 = vperm.slane %v105_v28, 1  ;;  %v178_v31 = vperm.slane %v105_v28, 2  ;;  %v179_v33 = vperm.slane %v105_v28, 3 }
  0x86   :  { %278 = vst [vmem:[#allocation1 + $0x3] ss:$9 sm:$0xff] %v147_v56  ;;  %v180_v34 = vperm.slane %v105_v28, 4  ;;  %v181_v35 = vperm.slane %v105_v28, 5  ;;  %v182_v36 = vperm.slane %v105_v28, 6  ;;  %v183_v37 = vperm.slane %v105_v28, 7 }
  0x87   :  { %280 = vst [vmem:[#allocation1 + $0x4] ss:$9 sm:$0xff] %v148_v57 }
  0x88   :  { %282 = vst [vmem:[#allocation1 + $0x5] ss:$9 sm:$0xff] %v149_v58  ;;  %v99_v61 = vpop.xlane.xlu0 %98  ;;  %v103_v18 = vpop.xlane.xlu1 %102 }
  0x89   :  { %284 = vst [vmem:[#allocation1 + $0x6] ss:$9 sm:$0xff] %v150_v59  ;;  %v152_v62 = vperm.slane %v99_v61, 0  ;;  %v153_v63 = vperm.slane %v99_v61, 1  ;;  %v154_v0 = vperm.slane %v99_v61, 2  ;;  %v155_v3 = vperm.slane %v99_v61, 3  ;;  %v107_v38 = vpop.xlane.xlu2 %106 }
  0x8a   :  { %286 = vst [vmem:[#allocation1 + $0x7] ss:$9 sm:$0xff] %v151_v60  ;;  %v156_v4 = vperm.slane %v99_v61, 4  ;;  %v157_v5 = vperm.slane %v99_v61, 5  ;;  %v158_v6 = vperm.slane %v99_v61, 6  ;;  %v159_v7 = vperm.slane %v99_v61, 7 }
  0x8b   :  { %v168_v19 = vperm.slane %v103_v18, 0  ;;  %v169_v20 = vperm.slane %v103_v18, 1  ;;  %v170_v21 = vperm.slane %v103_v18, 2  ;;  %v171_v23 = vperm.slane %v103_v18, 3 }
  0x8c   :  { %v172_v24 = vperm.slane %v103_v18, 4  ;;  %v173_v25 = vperm.slane %v103_v18, 5  ;;  %v174_v26 = vperm.slane %v103_v18, 6  ;;  %v175_v27 = vperm.slane %v103_v18, 7 }
  0x8d   :  { %v184_v39 = vperm.slane %v107_v38, 0  ;;  %v185_v40 = vperm.slane %v107_v38, 1  ;;  %v186_v41 = vperm.slane %v107_v38, 2  ;;  %v187_v43 = vperm.slane %v107_v38, 3 }
  0x8e   :  { %v188_v44 = vperm.slane %v107_v38, 4  ;;  %v189_v45 = vperm.slane %v107_v38, 5  ;;  %v190_v46 = vperm.slane %v107_v38, 6  ;;  %v191_v47 = vperm.slane %v107_v38, 7 }
  0x90   :  { %v109_v48 = vpop.xlane.xlu0 %108  ;;  %v111_v58 = vpop.xlane.xlu1 %110 }
  0x91   :  { %v287_v2 = vld [vmem:[#allocation1] sm:$0xff]  ;;  %v192_v49 = vperm.slane %v109_v48, 0  ;;  %v193_v50 = vperm.slane %v109_v48, 1  ;;  %v194_v51 = vperm.slane %v109_v48, 2  ;;  %v195_v53 = vperm.slane %v109_v48, 3 }
  0x92   :  { %288 = vst [vmem:[#allocation1] ss:$9 sm:$0xff] %v152_v62  ;;  %424 = vperm.xlu1 %567, %v287_v2   ;;  %v196_v54 = vperm.slane %v109_v48, 4  ;;  %v197_v55 = vperm.slane %v109_v48, 5  ;;  %v198_v56 = vperm.slane %v109_v48, 6  ;;  %v199_v57 = vperm.slane %v109_v48, 7 }
  0x93   :  { %289 = vst [vmem:[#allocation1 + $0x1] ss:$9 sm:$0xff] %v153_v63  ;;  %v200_v59 = vperm.slane %v111_v58, 0  ;;  %v201_v60 = vperm.slane %v111_v58, 1  ;;  %v202_v61 = vperm.slane %v111_v58, 2  ;;  %v203_v63 = vperm.slane %v111_v58, 3 }
  0x94   :  { %290 = vst [vmem:[#allocation1 + $0x2] ss:$9 sm:$0xff] %v154_v0  ;;  %v204_v0 = vperm.slane %v111_v58, 4  ;;  %v205_v2 = vperm.slane %v111_v58, 5 }
  0x95   :  { %291 = vst [vmem:[#allocation1 + $0x3] ss:$9 sm:$0xff] %v155_v3  ;;  %v206_v3 = vperm.slane %v111_v58, 6 }
  0x96   :  { %292 = vst [vmem:[#allocation1 + $0x4] ss:$9 sm:$0xff] %v156_v4  ;;  %v207_v4 = vperm.slane %v111_v58, 7 }
  0x97   :  { %293 = vst [vmem:[#allocation1 + $0x5] ss:$9 sm:$0xff] %v157_v5  ;;  %v113_v5 = vpop.xlane.xlu2 %112 }
  0x98   :  { %294 = vst [vmem:[#allocation1 + $0x6] ss:$9 sm:$0xff] %v158_v6  ;;  %v208_v6 = vperm.slane %v113_v5, 0  ;;  %v210_v8 = vperm.slane %v113_v5, 2 }
  0x99   :  { %295 = vst [vmem:[#allocation1 + $0x7] ss:$9 sm:$0xff] %v159_v7  ;;  %v209_v7 = vperm.slane %v113_v5, 1 }
  0xa0   :  { %v296_v12 = vld [vmem:[#allocation1] sm:$0xff] }
  0xa1   :  { %297 = vst [vmem:[#allocation1] ss:$9 sm:$0xff] %v160_v9  ;;  %427 = vperm.xlu2 %568, %v296_v12   ;;  %v213_v12 = vperm.slane %v113_v5, 5 }
  0xa2   :  { %298 = vst [vmem:[#allocation1 + $0x1] ss:$9 sm:$0xff] %v161_v10  ;;  %v211_v10 = vperm.slane %v113_v5, 3 }
  0xa3   :  { %299 = vst [vmem:[#allocation1 + $0x2] ss:$9 sm:$0xff] %v162_v11  ;;  %v212_v11 = vperm.slane %v113_v5, 4 }
  0xa4   :  { %300 = vst [vmem:[#allocation1 + $0x3] ss:$9 sm:$0xff] %v163_v13  ;;  %v214_v13 = vperm.slane %v113_v5, 6 }
  0xa5   :  { %301 = vst [vmem:[#allocation1 + $0x4] ss:$9 sm:$0xff] %v164_v14  ;;  %v215_v14 = vperm.slane %v113_v5, 7 }
  0xa6   :  { %302 = vst [vmem:[#allocation1 + $0x5] ss:$9 sm:$0xff] %v165_v15  ;;  %v115_v15 = vpop.xlane.xlu0 %114 }
  0xa7   :  { %303 = vst [vmem:[#allocation1 + $0x6] ss:$9 sm:$0xff] %v166_v16  ;;  %v216_v16 = vperm.slane %v115_v15, 0  ;;  %v218_v18 = vperm.slane %v115_v15, 2 }
  0xa8   :  { %304 = vst [vmem:[#allocation1 + $0x7] ss:$9 sm:$0xff] %v167_v17  ;;  %v217_v17 = vperm.slane %v115_v15, 1 }
  0xaf   :  { %v305_v22 = vld [vmem:[#allocation1] sm:$0xff] }
  0xb0   :  { %306 = vst [vmem:[#allocation1] ss:$9 sm:$0xff] %v168_v19  ;;  %430 = vperm.xlu0 %569, %v305_v22   ;;  %v221_v22 = vperm.slane %v115_v15, 5 }
  0xb1   :  { %307 = vst [vmem:[#allocation1 + $0x1] ss:$9 sm:$0xff] %v169_v20  ;;  %v219_v20 = vperm.slane %v115_v15, 3 }
  0xb2   :  { %308 = vst [vmem:[#allocation1 + $0x2] ss:$9 sm:$0xff] %v170_v21  ;;  %v220_v21 = vperm.slane %v115_v15, 4 }
  0xb3   :  { %309 = vst [vmem:[#allocation1 + $0x3] ss:$9 sm:$0xff] %v171_v23  ;;  %v222_v23 = vperm.slane %v115_v15, 6 }
  0xb4   :  { %310 = vst [vmem:[#allocation1 + $0x4] ss:$9 sm:$0xff] %v172_v24  ;;  %v223_v24 = vperm.slane %v115_v15, 7 }
  0xb5   :  { %311 = vst [vmem:[#allocation1 + $0x5] ss:$9 sm:$0xff] %v173_v25  ;;  %v117_v25 = vpop.xlane.xlu1 %116 }
  0xb6   :  { %312 = vst [vmem:[#allocation1 + $0x6] ss:$9 sm:$0xff] %v174_v26  ;;  %v224_v26 = vperm.slane %v117_v25, 0  ;;  %v226_v28 = vperm.slane %v117_v25, 2 }
  0xb7   :  { %313 = vst [vmem:[#allocation1 + $0x7] ss:$9 sm:$0xff] %v175_v27  ;;  %v225_v27 = vperm.slane %v117_v25, 1 }
  0xbe   :  { %v314_v32 = vld [vmem:[#allocation1] sm:$0xff] }
  0xbf   :  { %315 = vst [vmem:[#allocation1] ss:$9 sm:$0xff] %v176_v29  ;;  %433 = vperm.xlu2 %568, %v314_v32   ;;  %v229_v32 = vperm.slane %v117_v25, 5 }
  0xc0   :  { %316 = vst [vmem:[#allocation1 + $0x1] ss:$9 sm:$0xff] %v177_v30  ;;  %v227_v30 = vperm.slane %v117_v25, 3 }
  0xc1   :  { %317 = vst [vmem:[#allocation1 + $0x2] ss:$9 sm:$0xff] %v178_v31  ;;  %v228_v31 = vperm.slane %v117_v25, 4 }
  0xc2   :  { %318 = vst [vmem:[#allocation1 + $0x3] ss:$9 sm:$0xff] %v179_v33  ;;  %v230_v33 = vperm.slane %v117_v25, 6 }
  0xc3   :  { %319 = vst [vmem:[#allocation1 + $0x4] ss:$9 sm:$0xff] %v180_v34  ;;  %v231_v34 = vperm.slane %v117_v25, 7  ;;  %v629_v25 = vmov 0.0  }
  0xc4   :  { %320 = vst [vmem:[#allocation1 + $0x5] ss:$9 sm:$0xff] %v181_v35  ;;  %v119_v35 = vpop.xlane.xlu2 %118 }
  0xc5   :  { %321 = vst [vmem:[#allocation1 + $0x6] ss:$9 sm:$0xff] %v182_v36  ;;  %v232_v36 = vperm.slane %v119_v35, 0  ;;  %v234_v38 = vperm.slane %v119_v35, 2 }
  0xc6   :  { %322 = vst [vmem:[#allocation1 + $0x7] ss:$9 sm:$0xff] %v183_v37  ;;  %v233_v37 = vperm.slane %v119_v35, 1 }
  0xc7   :  { %36 = vst [vmem:[#allocation6] sm:$0x1] %v629_v25  ;;  %v540_v25 = vstv %s716_s2 }
  0xcd   :  { %v323_v42 = vld [vmem:[#allocation1] sm:$0xff] }
  0xce   :  { %324 = vst [vmem:[#allocation1] ss:$9 sm:$0xff] %v184_v39  ;;  %436 = vperm.xlu1 %567, %v323_v42   ;;  %v237_v42 = vperm.slane %v119_v35, 5 }
  0xcf   :  { %325 = vst [vmem:[#allocation1 + $0x1] ss:$9 sm:$0xff] %v185_v40  ;;  %v235_v40 = vperm.slane %v119_v35, 3 }
  0xd0   :  { %326 = vst [vmem:[#allocation1 + $0x2] ss:$9 sm:$0xff] %v186_v41  ;;  %v236_v41 = vperm.slane %v119_v35, 4 }
  0xd1   :  { %327 = vst [vmem:[#allocation1 + $0x3] ss:$9 sm:$0xff] %v187_v43  ;;  %v238_v43 = vperm.slane %v119_v35, 6 }
  0xd2   :  { %328 = vst [vmem:[#allocation1 + $0x4] ss:$9 sm:$0xff] %v188_v44  ;;  %v239_v44 = vperm.slane %v119_v35, 7  ;;  %v484_v35 = vadd.s32 4294967264, %v654_v1 }
  0xd3   :  { %329 = vst [vmem:[#allocation1 + $0x5] ss:$9 sm:$0xff] %v189_v45  ;;  %v121_v45 = vpop.xlane.xlu0 %120 }
  0xd4   :  { %330 = vst [vmem:[#allocation1 + $0x6] ss:$9 sm:$0xff] %v190_v46  ;;  %v240_v46 = vperm.slane %v121_v45, 0  ;;  %v242_v48 = vperm.slane %v121_v45, 2 }
  0xd5   :  { %331 = vst [vmem:[#allocation1 + $0x7] ss:$9 sm:$0xff] %v191_v47  ;;  %v241_v47 = vperm.slane %v121_v45, 1 }
  0xdc   :  { %v332_v52 = vld [vmem:[#allocation1] sm:$0xff] }
  0xdd   :  { %333 = vst [vmem:[#allocation1] ss:$9 sm:$0xff] %v192_v49  ;;  %439 = vperm.xlu2 %568, %v332_v52   ;;  %v245_v52 = vperm.slane %v121_v45, 5 }
  0xde   :  { %334 = vst [vmem:[#allocation1 + $0x1] ss:$9 sm:$0xff] %v193_v50  ;;  %v243_v50 = vperm.slane %v121_v45, 3 }
  0xdf   :  { %335 = vst [vmem:[#allocation1 + $0x2] ss:$9 sm:$0xff] %v194_v51  ;;  %v244_v51 = vperm.slane %v121_v45, 4 }
  0xe0   :  { %336 = vst [vmem:[#allocation1 + $0x3] ss:$9 sm:$0xff] %v195_v53  ;;  %v246_v53 = vperm.slane %v121_v45, 6 }
  0xe1   :  { %337 = vst [vmem:[#allocation1 + $0x4] ss:$9 sm:$0xff] %v196_v54  ;;  %v247_v54 = vperm.slane %v121_v45, 7  ;;  %v488_v45 = vadd.s32 4294967256, %v654_v1 }
  0xe2   :  { %338 = vst [vmem:[#allocation1 + $0x5] ss:$9 sm:$0xff] %v197_v55  ;;  %v123_v55 = vpop.xlane.xlu1 %122 }
  0xe3   :  { %339 = vst [vmem:[#allocation1 + $0x6] ss:$9 sm:$0xff] %v198_v56  ;;  %v248_v56 = vperm.slane %v123_v55, 0  ;;  %v250_v58 = vperm.slane %v123_v55, 2 }
  0xe4   :  { %340 = vst [vmem:[#allocation1 + $0x7] ss:$9 sm:$0xff] %v199_v57  ;;  %v249_v57 = vperm.slane %v123_v55, 1 }
  0xeb   :  { %v341_v62 = vld [vmem:[#allocation1] sm:$0xff] }
  0xec   :  { %342 = vst [vmem:[#allocation1] ss:$9 sm:$0xff] %v200_v59  ;;  %442 = vperm.xlu1 %567, %v341_v62   ;;  %v251_v59 = vperm.slane %v123_v55, 3  ;;  %v253_v62 = vperm.slane %v123_v55, 5 }
  0xed   :  { %343 = vst [vmem:[#allocation1 + $0x1] ss:$9 sm:$0xff] %v201_v60 }
  0xee   :  { %344 = vst [vmem:[#allocation1 + $0x2] ss:$9 sm:$0xff] %v202_v61  ;;  %v252_v61 = vperm.slane %v123_v55, 4 }
  0xef   :  { %345 = vst [vmem:[#allocation1 + $0x3] ss:$9 sm:$0xff] %v203_v63  ;;  %v254_v63 = vperm.slane %v123_v55, 6 }
  0xf0   :  { %346 = vst [vmem:[#allocation1 + $0x4] ss:$9 sm:$0xff] %v204_v0  ;;  %v255_v0 = vperm.slane %v123_v55, 7 }
  0xf1   :  { %347 = vst [vmem:[#allocation1 + $0x5] ss:$9 sm:$0xff] %v205_v2  ;;  %v125_v2 = vpop.xlane.xlu2 %124 }
  0xf2   :  { %348 = vst [vmem:[#allocation1 + $0x6] ss:$9 sm:$0xff] %v206_v3  ;;  %v256_v3 = vperm.slane %v125_v2, 0  ;;  %v258_v5 = vperm.slane %v125_v2, 2 }
  0xf3   :  { %349 = vst [vmem:[#allocation1 + $0x7] ss:$9 sm:$0xff] %v207_v4  ;;  %v257_v4 = vperm.slane %v125_v2, 1 }
  0xfa   :  { %v350_v9 = vld [vmem:[#allocation1] sm:$0xff] }
  0xfb   :  { %351 = vst [vmem:[#allocation1] ss:$9 sm:$0xff] %v208_v6  ;;  %445 = vperm.xlu2 %568, %v350_v9   ;;  %v259_v6 = vperm.slane %v125_v2, 3  ;;  %v261_v9 = vperm.slane %v125_v2, 5 }
  0xfc   :  { %352 = vst [vmem:[#allocation1 + $0x1] ss:$9 sm:$0xff] %v209_v7 }
  0xfd   :  { %353 = vst [vmem:[#allocation1 + $0x2] ss:$9 sm:$0xff] %v210_v8  ;;  %v260_v8 = vperm.slane %v125_v2, 4 }
  0xfe   :  { %354 = vst [vmem:[#allocation1 + $0x3] ss:$9 sm:$0xff] %v211_v10  ;;  %v262_v10 = vperm.slane %v125_v2, 6 }
  0xff   :  { %355 = vst [vmem:[#allocation1 + $0x4] ss:$9 sm:$0xff] %v212_v11  ;;  %v263_v11 = vperm.slane %v125_v2, 7 }
 0x100   :  { %356 = vst [vmem:[#allocation1 + $0x5] ss:$9 sm:$0xff] %v213_v12  ;;  %v127_v12 = vpop.xlane.xlu0 %126 }
 0x101   :  { %357 = vst [vmem:[#allocation1 + $0x6] ss:$9 sm:$0xff] %v214_v13  ;;  %v264_v13 = vperm.slane %v127_v12, 0  ;;  %v266_v15 = vperm.slane %v127_v12, 2 }
 0x102   :  { %358 = vst [vmem:[#allocation1 + $0x7] ss:$9 sm:$0xff] %v215_v14  ;;  %v265_v14 = vperm.slane %v127_v12, 1 }
 0x109   :  { %v359_v19 = vld [vmem:[#allocation1] sm:$0xff] }
 0x10a   :  { %360 = vst [vmem:[#allocation1] ss:$9 sm:$0xff] %v216_v16  ;;  %448 = vperm.xlu1 %567, %v359_v19   ;;  %v267_v16 = vperm.slane %v127_v12, 3  ;;  %v269_v19 = vperm.slane %v127_v12, 5 }
 0x10b   :  { %361 = vst [vmem:[#allocation1 + $0x1] ss:$9 sm:$0xff] %v217_v17 }
 0x10c   :  { %362 = vst [vmem:[#allocation1 + $0x2] ss:$9 sm:$0xff] %v218_v18  ;;  %v268_v18 = vperm.slane %v127_v12, 4 }
 0x10d   :  { %363 = vst [vmem:[#allocation1 + $0x3] ss:$9 sm:$0xff] %v219_v20  ;;  %v270_v20 = vperm.slane %v127_v12, 6 }
 0x10e   :  { %364 = vst [vmem:[#allocation1 + $0x4] ss:$9 sm:$0xff] %v220_v21  ;;  %v271_v21 = vperm.slane %v127_v12, 7 }
 0x10f   :  { %365 = vst [vmem:[#allocation1 + $0x5] ss:$9 sm:$0xff] %v221_v22 }
 0x110   :  { %366 = vst [vmem:[#allocation1 + $0x6] ss:$9 sm:$0xff] %v222_v23  ;;  %v425_v23 = vpop.permute.xlu1 %424 }
 0x111   :  { %367 = vst [vmem:[#allocation1 + $0x7] ss:$9 sm:$0xff] %v223_v24  ;;  %v428_v24 = vpop.permute.xlu2 %427 }
 0x118   :  { %v368_v29 = vld [vmem:[#allocation1] sm:$0xff] }
 0x119   :  { %369 = vst [vmem:[#allocation1] ss:$9 sm:$0xff] %v224_v26  ;;  %451 = vperm.xlu0 %569, %v368_v29  }
 0x11a   :  { %370 = vst [vmem:[#allocation1 + $0x1] ss:$9 sm:$0xff] %v225_v27  ;;  %v434_v27 = vpop.permute.xlu2 %433 }
 0x11b   :  { %371 = vst [vmem:[#allocation1 + $0x2] ss:$9 sm:$0xff] %v226_v28 }
 0x11c   :  { %372 = vst [vmem:[#allocation1 + $0x3] ss:$9 sm:$0xff] %v227_v30  ;;  %v476_v30 = vadd.s32 4294967280, %v654_v1 }
 0x11d   :  { %373 = vst [vmem:[#allocation1 + $0x4] ss:$9 sm:$0xff] %v228_v31  ;;  %v472_v31 = vadd.s32 4294967288, %v654_v1 }
 0x11e   :  { %374 = vst [vmem:[#allocation1 + $0x5] ss:$9 sm:$0xff] %v229_v32 }
 0x11f   :  { %375 = vst [vmem:[#allocation1 + $0x6] ss:$9 sm:$0xff] %v230_v33  ;;  %v471_v33 = vperm.slane %v425_v23, %v654_v1 }
 0x120   :  { %376 = vst [vmem:[#allocation1 + $0x7] ss:$9 sm:$0xff] %v231_v34 }
 0x122   :  { %v431_v32 = vpop.permute.xlu0 %430 }
 0x123   :  { %v477_v34 = vperm.slane %v431_v32, %v476_v30 }
 0x127   :  { %v377_v39 = vld [vmem:[#allocation1] sm:$0xff] }
 0x128   :  { %378 = vst [vmem:[#allocation1] ss:$9 sm:$0xff] %v232_v36  ;;  %454 = vperm.xlu2 %568, %v377_v39   ;;  %v473_v36 = vperm.slane %v428_v24, %v472_v31 }
 0x129   :  { %379 = vst [vmem:[#allocation1 + $0x1] ss:$9 sm:$0xff] %v233_v37  ;;  %v480_v37 = vadd.s32 4294967272, %v654_v1 }
 0x12a   :  { %380 = vst [vmem:[#allocation1 + $0x2] ss:$9 sm:$0xff] %v234_v38  ;;  %v475_v38 = vsel %vm474_vm1, %v473_v36, %v471_v33 }
 0x12b   :  { %381 = vst [vmem:[#allocation1 + $0x3] ss:$9 sm:$0xff] %v235_v40  ;;  %v479_v40 = vsel %vm478_vm2, %v477_v34, %v475_v38 }
 0x12c   :  { %382 = vst [vmem:[#allocation1 + $0x4] ss:$9 sm:$0xff] %v236_v41 }
 0x12d   :  { %383 = vst [vmem:[#allocation1 + $0x5] ss:$9 sm:$0xff] %v237_v42 }
 0x12e   :  { %384 = vst [vmem:[#allocation1 + $0x6] ss:$9 sm:$0xff] %v238_v43  ;;  %v492_v43 = vadd.s32 4294967248, %v654_v1 }
 0x12f   :  { %385 = vst [vmem:[#allocation1 + $0x7] ss:$9 sm:$0xff] %v239_v44  ;;  %v481_v44 = vperm.slane %v434_v27, %v480_v37 }
 0x136   :  { %v386_v49 = vld [vmem:[#allocation1] sm:$0xff] }
 0x137   :  { %387 = vst [vmem:[#allocation1] ss:$9 sm:$0xff] %v240_v46  ;;  %457 = vperm.xlu1 %567, %v386_v49   ;;  %v440_v29 = vpop.permute.xlu2 %439  ;;  %v483_v46 = vsel %vm482_vm3, %v481_v44, %v479_v40 }
 0x138   :  { %388 = vst [vmem:[#allocation1 + $0x1] ss:$9 sm:$0xff] %v241_v47 }
 0x139   :  { %389 = vst [vmem:[#allocation1 + $0x2] ss:$9 sm:$0xff] %v242_v48 }
 0x13a   :  { %390 = vst [vmem:[#allocation1 + $0x3] ss:$9 sm:$0xff] %v243_v50  ;;  %v500_v50 = vadd.s32 4294967232, %v654_v1 }
 0x13b   :  { %391 = vst [vmem:[#allocation1 + $0x4] ss:$9 sm:$0xff] %v244_v51  ;;  %v489_v51 = vperm.slane %v440_v29, %v488_v45 }
 0x13c   :  { %392 = vst [vmem:[#allocation1 + $0x5] ss:$9 sm:$0xff] %v245_v52  ;;  %v496_v52 = vadd.s32 4294967240, %v654_v1 }
 0x13d   :  { %393 = vst [vmem:[#allocation1 + $0x6] ss:$9 sm:$0xff] %v246_v53  ;;  %v504_v53 = vadd.s32 4294967224, %v654_v1 }
 0x13e   :  { %394 = vst [vmem:[#allocation1 + $0x7] ss:$9 sm:$0xff] %v247_v54 }
 0x140   :  { %v437_v26 = vpop.permute.xlu1 %436 }
 0x141   :  { %v485_v41 = vperm.slane %v437_v26, %v484_v35 }
 0x143   :  { %v487_v48 = vsel %vm486_vm4, %v485_v41, %v483_v46 }
 0x144   :  { %v491_v54 = vsel %vm490_vm5, %v489_v51, %v487_v48 }
 0x145   :  { %v395_v60 = vld [vmem:[#allocation1] sm:$0xff] }
 0x146   :  { %460 = vperm.xlu0 %569, %v395_v60   ;;  %396 = vst [vmem:[#allocation1] ss:$9 sm:$0xff] %v248_v56 }
 0x147   :  { %397 = vst [vmem:[#allocation1 + $0x1] ss:$9 sm:$0xff] %v249_v57 }
 0x148   :  { %398 = vst [vmem:[#allocation1 + $0x2] ss:$9 sm:$0xff] %v250_v58 }
 0x149   :  { %399 = vst [vmem:[#allocation1 + $0x3] ss:$9 sm:$0xff] %v251_v59 }
 0x14a   :  { %400 = vst [vmem:[#allocation1 + $0x4] ss:$9 sm:$0xff] %v252_v61  ;;  %v512_v61 = vadd.s32 4294967208, %v654_v1 }
 0x14b   :  { %401 = vst [vmem:[#allocation1 + $0x5] ss:$9 sm:$0xff] %v253_v62  ;;  %v508_v62 = vadd.s32 4294967216, %v654_v1 }
 0x14c   :  { %402 = vst [vmem:[#allocation1 + $0x6] ss:$9 sm:$0xff] %v254_v63  ;;  %v516_v63 = vadd.s32 4294967200, %v654_v1 }
 0x14d   :  { %403 = vst [vmem:[#allocation1 + $0x7] ss:$9 sm:$0xff] %v255_v0 }
 0x154   :  { %v404_v7 = vld [vmem:[#allocation1] sm:$0xff] }
 0x155   :  { %463 = vperm.xlu2 %568, %v404_v7   ;;  %405 = vst [vmem:[#allocation1] ss:$9 sm:$0xff] %v256_v3  ;;  %v446_v42 = vpop.permute.xlu2 %445 }
 0x156   :  { %406 = vst [vmem:[#allocation1 + $0x1] ss:$9 sm:$0xff] %v257_v4  ;;  %v497_v59 = vperm.slane %v446_v42, %v496_v52 }
 0x157   :  { %407 = vst [vmem:[#allocation1 + $0x2] ss:$9 sm:$0xff] %v258_v5 }
 0x158   :  { %408 = vst [vmem:[#allocation1 + $0x3] ss:$9 sm:$0xff] %v259_v6 }
 0x159   :  { %409 = vst [vmem:[#allocation1 + $0x4] ss:$9 sm:$0xff] %v260_v8  ;;  %v524_v8 = vadd.s32 4294967184, %v654_v1 }
 0x15a   :  { %410 = vst [vmem:[#allocation1 + $0x5] ss:$9 sm:$0xff] %v261_v9  ;;  %v520_v9 = vadd.s32 4294967192, %v654_v1 }
 0x15b   :  { %411 = vst [vmem:[#allocation1 + $0x6] ss:$9 sm:$0xff] %v262_v10 }
 0x15c   :  { %412 = vst [vmem:[#allocation1 + $0x7] ss:$9 sm:$0xff] %v263_v11 }
 0x15e   :  { %v443_v28 = vpop.permute.xlu1 %442 }
 0x15f   :  { %v493_v49 = vperm.slane %v443_v28, %v492_v43 }
 0x161   :  { %v495_v56 = vsel %vm494_vm6, %v493_v49, %v491_v54 }
 0x162   :  { %v499_v0 = vsel %vm498_vm7, %v497_v59, %v495_v56 }
 0x163   :  { %v413_v17 = vld [vmem:[#allocation1] sm:$0xff] }
 0x164   :  { %466 = vperm.xlu1 %567, %v413_v17   ;;  %414 = vst [vmem:[#allocation1] ss:$9 sm:$0xff] %v264_v13 }
 0x165   :  { %415 = vst [vmem:[#allocation1 + $0x1] ss:$9 sm:$0xff] %v265_v14  ;;  %v528_v14 = vadd.s32 4294967176, %v654_v1 }
 0x166   :  { %416 = vst [vmem:[#allocation1 + $0x2] ss:$9 sm:$0xff] %v266_v15 }
 0x167   :  { %417 = vst [vmem:[#allocation1 + $0x3] ss:$9 sm:$0xff] %v267_v16 }
 0x168   :  { %418 = vst [vmem:[#allocation1 + $0x4] ss:$9 sm:$0xff] %v268_v18 }
 0x169   :  { %419 = vst [vmem:[#allocation1 + $0x5] ss:$9 sm:$0xff] %v269_v19 }
 0x16a   :  { %420 = vst [vmem:[#allocation1 + $0x6] ss:$9 sm:$0xff] %v270_v20  ;;  %v95_v20 = vld [vmem:[#allocation6] sm:$0x1] }
 0x16b   :  { %421 = vst [vmem:[#allocation1 + $0x7] ss:$9 sm:$0xff] %v271_v21 }
 0x172   :  { %v422_v22 = vld [vmem:[#allocation1] sm:$0xff] }
 0x173   :  { %469 = vperm.xlu0 %569, %v422_v22  }
 0x17c   :  { %v449_v39 = vpop.permute.xlu1 %448 }
 0x17d   :  { %v501_v58 = vperm.slane %v449_v39, %v500_v50 }
 0x17f   :  { %v503_v3 = vsel %vm502_vm8, %v501_v58, %v499_v0 }
 0x182   :  { %v455_v57 = vpop.permute.xlu2 %454 }
 0x183   :  { %v509_v6 = vperm.slane %v455_v57, %v508_v62 }
 0x18b   :  { %v452_v47 = vpop.permute.xlu0 %451 }
 0x18c   :  { %v505_v60 = vperm.slane %v452_v47, %v504_v53 }
 0x18e   :  { %v507_v4 = vsel %vm506_vm9, %v505_v60, %v503_v3 }
 0x18f   :  { %v511_v12 = vsel %vm510_vm10, %v509_v6, %v507_v4 }
 0x1a9   :  { %v458_v55 = vpop.permute.xlu1 %457 }
 0x1aa   :  { %v513_v5 = vperm.slane %v458_v55, %v512_v61 }
 0x1ac   :  { %v515_v13 = vsel %vm514_vm11, %v513_v5, %v511_v12 }
 0x1af   :  { %v464_v11 = vpop.permute.xlu2 %463 }
 0x1b0   :  { %v521_v17 = vperm.slane %v464_v11, %v520_v9 }
 0x1b8   :  { %v461_v2 = vpop.permute.xlu0 %460 }
 0x1b9   :  { %v517_v7 = vperm.slane %v461_v2, %v516_v63 }
 0x1bb   :  { %v519_v15 = vsel %vm518_vm12, %v517_v7, %v515_v13 }
 0x1bc   :  { %v523_v19 = vsel %vm522_vm13, %v521_v17, %v519_v15 }
 0x1d6   :  { %v467_v10 = vpop.permute.xlu1 %466 }
 0x1d7   :  { %v525_v16 = vperm.slane %v467_v10, %v524_v8 }
 0x1d9   :  { %v527_v22 = vsel %vm526_vm14, %v525_v16, %v523_v19 }
 0x1e5   :  { %v470_v18 = vpop.permute.xlu0 %469 }
 0x1e6   :  { %v529_v21 = vperm.slane %v470_v18, %v528_v14 }
 0x1e8   :  { %v531_v23 = vsel %vm530_vm15, %v529_v21, %v527_v22 }
 0x1e9   :  { %v533_v24 = vadd.f32 %v531_v23, %v95_v20 }
 0x1eb   :  { %534 = vst [vmem:[#allocation6] sm:$0x1] %v533_v24 }
 0x1f2   :  { %v538_v26 = vld [vmem:[#allocation6] sm:$0x1] }
 0x1f3   :  { %v541_v1 = vadd.f32 %v540_v25, %v538_v26 }
 0x1f5   :  { %571 = vtanh.f32 %v541_v1 }
 0x1fb   :  { %v572_v27 = vpop.eup %571 }
 0x1fc   :  { %543 = vst [vmem:[#allocation6] sm:$0x1] %v572_v27 }
 0x1fd   :  { %554 = dma.vmem_to_hbm [thread:$0]  %s550_s22, 16, %s552_s25, [#allocation5]  }
 0x1fe   :  { %623 = dma.done.wait [#allocation5], 16  }
 0x1ff   :  { %624 = vsyncadd [#allocation5], 4294967280 }
 0x200   :  { %559 = vsyncpa [#allocation4], 1 }
 0x201   :  { %560 = vsyncpa [#allocation5], 1 }

</bundles_post_ra>
